<compile_context>
chip_gen: v7x
topology: tpu7x:2x2x1
jax: 0.10.0
libtpu: 0.0.40
codegen_flags: <defaults>
</compile_context>

<pallas_src>
import functools

import jax
import jax.numpy as jnp
from jax.experimental import pallas as pl
from jax.experimental.pallas import tpu as pltpu


def _round_up(x, m):
    return ((x + m - 1) // m) * m


def _attention_kernel(z_ref, w1_ref, b1_ref, w2_ref, out_ref, beta_ref, *,
                      compute_dtype, approx_recip):
    tn, m, d = z_ref.shape
    h = w2_ref.shape[1]

    z = z_ref[...]                                        # (TN, M, D) f32
    z2 = z.reshape(tn * m, d)                             # (TN*M, D) -- MXU-friendly 2D

    # Linear1 + Tanh: MXU matmul (bf16 operands, f32 accumulate), bias added in f32.
    hid = jnp.tanh(
        jnp.dot(z2.astype(compute_dtype),
                w1_ref[...].astype(compute_dtype),
                preferred_element_type=jnp.float32)
        + b1_ref[...]                                     # (1, H) broadcasts over rows
    )                                                     # (TN*M, H) f32

    # Linear2 (no bias).
    w = jnp.dot(hid.astype(compute_dtype),
                w2_ref[...].astype(compute_dtype),
                preferred_element_type=jnp.float32)       # (TN*M, H) f32
    w = w.reshape(tn, m, h)                               # (TN, M, H)

    # Numerically-stable softmax over the view axis (axis=1).
    w_max = jnp.max(w, axis=1, keepdims=True)             # (TN, 1, H)
    e = jnp.exp(w - w_max)                                # (TN, M, H)
    denom = jnp.sum(e, axis=1, keepdims=True)             # (TN, 1, H)
    r = pl.reciprocal(denom, approx=approx_recip)         # EUP slot when approx=True

    beta_ref[...] = (e * r).astype(beta_ref.dtype)        # (TN, M, H)

    # out = sum_m beta_m * z_m = (sum_m e_m * z_m) * (1/denom)   (requires H == D)
    num = jnp.sum(e * z, axis=1)                          # (TN, D) f32
    out_ref[...] = (num * r[:, 0, :]).astype(out_ref.dtype)


def attention_pallas(z, w1, b1, w2, *, tn=512,
                     compute_dtype=jnp.bfloat16,
                     approx_reciprocal=True,
                     vmem_limit_bytes=48 * 1024 * 1024):
    """z: (N, M, D) f32; w1: (D, H); b1: (H,); w2: (H, H).  Requires H == D."""
    N, M, D = z.shape
    H = w2.shape[1]
    assert w1.shape == (D, H) and b1.shape == (H,) and w2.shape == (H, H)
    assert D == H, "Attention module requires in_size == hidden_size for beta * z"

    # Effective batch tile: large (memory-bound kernel), but clamped to the batch
    # size and aligned to the 8-sublane granule.  Pad N up to a tile multiple.
    tn_eff = max(8, min(tn, _round_up(N, 8)))
    tn_eff = _round_up(tn_eff, 8)
    n_pad = _round_up(N, tn_eff)
    z_p = z if n_pad == N else jnp.pad(z, ((0, n_pad - N), (0, 0), (0, 0)))

    b1_2d = b1.reshape(1, H)
    grid = (n_pad // tn_eff,)

    cost = pl.CostEstimate(
        flops=2 * n_pad * M * D * H + 2 * n_pad * M * H * H,
        transcendentals=2 * n_pad * M * H + n_pad * H,
        bytes_accessed=4 * (n_pad * M * D + n_pad * M * H + n_pad * D
                            + D * H + H * H + H),
    )

    kernel = functools.partial(_attention_kernel,
                               compute_dtype=compute_dtype,
                               approx_recip=approx_reciprocal)

    out, beta = pl.pallas_call(
        kernel,
        out_shape=(
            jax.ShapeDtypeStruct((n_pad, D), z.dtype),       # (beta * z).sum(1)
            jax.ShapeDtypeStruct((n_pad, M, H), z.dtype),    # beta
        ),
        grid_spec=pltpu.PrefetchScalarGridSpec(
            num_scalar_prefetch=0,
            grid=grid,
            in_specs=[
                pl.BlockSpec((tn_eff, M, D), lambda i: (i, 0, 0)),
                pl.BlockSpec((D, H), lambda i: (0, 0)),
                pl.BlockSpec((1, H), lambda i: (0, 0)),
                pl.BlockSpec((H, H), lambda i: (0, 0)),
            ],
            out_specs=[
                pl.BlockSpec((tn_eff, D), lambda i: (i, 0)),
                pl.BlockSpec((tn_eff, M, H), lambda i: (i, 0, 0)),
            ],
        ),
        compiler_params=pltpu.CompilerParams(
            dimension_semantics=("parallel",),
            vmem_limit_bytes=vmem_limit_bytes,
        ),
        cost_estimate=cost,
    )(z_p, w1, b1_2d, w2)

    if n_pad != N:
        out = out[:N]
        beta = beta[:N]
    return out, beta


def attention_reference(z, w1, b1, w2):
    w = jnp.tanh(jnp.einsum("nmd,dh->nmh", z, w1) + b1) @ w2
    beta = jax.nn.softmax(w, axis=1)
    return (beta * z).sum(axis=1), beta


if __name__ == "__main__":
    # Small shapes: batch N=16, views M=4, in_size = hidden_size = 128.
    N, M, D = 16, 4, 128
    H = D

    key = jax.random.PRNGKey(0)
    kz, k1, kb, k2 = jax.random.split(key, 4)

    z = jax.random.normal(kz, (N, M, D), dtype=jnp.float32)

    # Deterministic parameter init (PyTorch-Linear-style uniform bounds).
    bound1 = 1.0 / (D ** 0.5)
    w1 = jax.random.uniform(k1, (D, H), jnp.float32, -bound1, bound1)
    b1 = jax.random.uniform(kb, (H,), jnp.float32, -bound1, bound1)
    bound2 = 1.0 / (H ** 0.5)
    w2 = jax.random.uniform(k2, (H, H), jnp.float32, -bound2, bound2)

    out_ref, beta_ref = attention_reference(z, w1, b1, w2)

    # 1) Full-precision path (exact reciprocal, f32 matmuls): tight tolerance.
    out32, beta32 = attention_pallas(z, w1, b1, w2,
                                     compute_dtype=jnp.float32,
                                     approx_reciprocal=False)
    jax.block_until_ready((out32, beta32))
    assert jnp.allclose(out32, out_ref, atol=1e-5, rtol=1e-5), "f32 output mismatch"
    assert jnp.allclose(beta32, beta_ref, atol=1e-5, rtol=1e-5), "f32 beta mismatch"

    # 2) Default fast path (bf16 MXU operands + approx reciprocal): loose tolerance.
    out_bf, beta_bf = attention_pallas(z, w1, b1, w2)
    jax.block_until_ready((out_bf, beta_bf))
    assert jnp.allclose(out_bf, out_ref, atol=5e-2, rtol=5e-2), "bf16 output mismatch"
    assert jnp.allclose(beta_bf, beta_ref, atol=5e-2, rtol=5e-2), "bf16 beta mismatch"

    # 3) Batch size not divisible by the tile / 8 (exercises the padding path).
    N2 = 13
    z2 = jax.random.normal(jax.random.PRNGKey(1), (N2, M, D), dtype=jnp.float32)
    out_p, beta_p = attention_pallas(z2, w1, b1, w2,
                                     compute_dtype=jnp.float32,
                                     approx_reciprocal=False)
    jax.block_until_ready((out_p, beta_p))
    out_p_ref, beta_p_ref = attention_reference(z2, w1, b1, w2)
    assert out_p.shape == (N2, D) and beta_p.shape == (N2, M, H)
    assert jnp.allclose(out_p, out_p_ref, atol=1e-5, rtol=1e-5), "padded output mismatch"
    assert jnp.allclose(beta_p, beta_p_ref, atol=1e-5, rtol=1e-5), "padded beta mismatch"

    print("KERNEL_OK")
</pallas_src>

<mosaic_0001>
module attributes {stable_mosaic.version = 11 : i64} {
  func.func @_attention_kernel(%arg0: i32, %arg1: memref<16x4x128xf32, #tpu.memory_space<vmem>>, %arg2: memref<128x128xf32, #tpu.memory_space<vmem>>, %arg3: memref<1x128xf32, #tpu.memory_space<vmem>>, %arg4: memref<128x128xf32, #tpu.memory_space<vmem>>, %arg5: memref<16x128xf32, #tpu.memory_space<vmem>>, %arg6: memref<16x4x128xf32, #tpu.memory_space<vmem>>) attributes {dimension_semantics = [#tpu.dimension_semantics<parallel>], iteration_bounds = array<i64: 1>, scalar_prefetch = 0 : i64, scratch_operands = 0 : i64, tpu.core_type = #tpu.core_type<tc>, window_params = [{transform_indices = @transform_0, window_bounds = array<i64: 16, 4, 128>}, {pipeline_mode = #tpu.pipeline_mode<synchronous>, transform_indices = @transform_1, window_bounds = array<i64: 128, 128>}, {pipeline_mode = #tpu.pipeline_mode<synchronous>, transform_indices = @transform_2, window_bounds = array<i64: 1, 128>}, {pipeline_mode = #tpu.pipeline_mode<synchronous>, transform_indices = @transform_3, window_bounds = array<i64: 128, 128>}, {transform_indices = @transform_4, window_bounds = array<i64: 16, 128>}, {transform_indices = @transform_5, window_bounds = array<i64: 16, 4, 128>}]} {
    %c0 = arith.constant 0 : index
    %c0_0 = arith.constant 0 : index
    %c0_1 = arith.constant 0 : index
    %0 = vector.load %arg1[%c0, %c0_0, %c0_1] : memref<16x4x128xf32, #tpu.memory_space<vmem>>, vector<16x4x128xf32>
    %1 = vector.shape_cast %0 : vector<16x4x128xf32> to vector<64x128xf32>
    %c0_2 = arith.constant 0 : index
    %c0_3 = arith.constant 0 : index
    %2 = vector.load %arg2[%c0_2, %c0_3] : memref<128x128xf32, #tpu.memory_space<vmem>>, vector<128x128xf32>
    %cst = arith.constant dense<0.000000e+00> : vector<64x128xf32>
    %3 = tpu.matmul %1, %2, %cst {dimension_numbers = #tpu.dot_dimension_numbers<[1], [0], [0], [1], [0, 0, 1, 1], [], []>} : vector<64x128xf32>, vector<128x128xf32>, vector<64x128xf32> -> vector<64x128xf32>
    %c0_4 = arith.constant 0 : index
    %c0_5 = arith.constant 0 : index
    %4 = vector.load %arg3[%c0_4, %c0_5] : memref<1x128xf32, #tpu.memory_space<vmem>>, vector<1x128xf32>
    %5 = vector.broadcast %4 : vector<1x128xf32> to vector<64x128xf32>
    %6 = arith.addf %3, %5 : vector<64x128xf32>
    %7 = math.tanh %6 : vector<64x128xf32>
    %c0_6 = arith.constant 0 : index
    %c0_7 = arith.constant 0 : index
    %8 = vector.load %arg4[%c0_6, %c0_7] : memref<128x128xf32, #tpu.memory_space<vmem>>, vector<128x128xf32>
    %cst_8 = arith.constant dense<0.000000e+00> : vector<64x128xf32>
    %9 = tpu.matmul %7, %8, %cst_8 {dimension_numbers = #tpu.dot_dimension_numbers<[1], [0], [0], [1], [0, 0, 1, 1], [], []>} : vector<64x128xf32>, vector<128x128xf32>, vector<64x128xf32> -> vector<64x128xf32>
    %10 = vector.shape_cast %9 : vector<64x128xf32> to vector<16x4x128xf32>
    %cst_9 = arith.constant dense<0xFF800000> : vector<16x128xf32>
    %11 = vector.multi_reduction <maximumf>, %10, %cst_9 [1] : vector<16x4x128xf32> to vector<16x128xf32>
    %12 = vector.shape_cast %11 : vector<16x128xf32> to vector<16x1x128xf32>
    %13 = vector.broadcast %12 : vector<16x1x128xf32> to vector<16x4x128xf32>
    %14 = arith.subf %10, %13 : vector<16x4x128xf32>
    %15 = math.exp %14 : vector<16x4x128xf32>
    %cst_10 = arith.constant dense<0.000000e+00> : vector<16x128xf32>
    %16 = vector.multi_reduction <add>, %15, %cst_10 [1] : vector<16x4x128xf32> to vector<16x128xf32>
    %17 = vector.shape_cast %16 : vector<16x128xf32> to vector<16x1x128xf32>
    %18 = tpu.reciprocal %17 : vector<16x1x128xf32> -> vector<16x1x128xf32>
    %19 = vector.broadcast %18 : vector<16x1x128xf32> to vector<16x4x128xf32>
    %20 = arith.mulf %15, %19 : vector<16x4x128xf32>
    %c0_11 = arith.constant 0 : index
    %c0_12 = arith.constant 0 : index
    %c0_13 = arith.constant 0 : index
    %21 = vector.load %arg6[%c0_11, %c0_12, %c0_13] : memref<16x4x128xf32, #tpu.memory_space<vmem>>, vector<16x4x128xf32>
    tpu.vector_store %arg6[%c0_11, %c0_12, %c0_13], %20 {strides = array<i32>} : memref<16x4x128xf32, #tpu.memory_space<vmem>>, vector<16x4x128xf32>,
    %22 = arith.mulf %15, %0 : vector<16x4x128xf32>
    %cst_14 = arith.constant dense<0.000000e+00> : vector<16x128xf32>
    %23 = vector.multi_reduction <add>, %22, %cst_14 [1] : vector<16x4x128xf32> to vector<16x128xf32>
    %24 = vector.shape_cast %18 : vector<16x1x128xf32> to vector<16x128xf32>
    %25 = arith.mulf %23, %24 : vector<16x128xf32>
    %c0_15 = arith.constant 0 : index
    %c0_16 = arith.constant 0 : index
    %26 = vector.load %arg5[%c0_15, %c0_16] : memref<16x128xf32, #tpu.memory_space<vmem>>, vector<16x128xf32>
    tpu.vector_store %arg5[%c0_15, %c0_16], %25 {strides = array<i32>} : memref<16x128xf32, #tpu.memory_space<vmem>>, vector<16x128xf32>,
    return
  }
  func.func @transform_0(%arg0: i32) -> (i32, i32, i32) {
    %c0_i32 = arith.constant 0 : i32
    %c0_i32_0 = arith.constant 0 : i32
    %c0_i32_1 = arith.constant 0 : i32
    return %arg0, %c0_i32, %c0_i32_0 : i32, i32, i32
  }
  func.func @transform_1(%arg0: i32) -> (i32, i32) {
    %c0_i32 = arith.constant 0 : i32
    %c0_i32_0 = arith.constant 0 : i32
    %c0_i32_1 = arith.constant 0 : i32
    return %c0_i32, %c0_i32_0 : i32, i32
  }
  func.func @transform_2(%arg0: i32) -> (i32, i32) {
    %c0_i32 = arith.constant 0 : i32
    %c0_i32_0 = arith.constant 0 : i32
    %c0_i32_1 = arith.constant 0 : i32
    return %c0_i32, %c0_i32_0 : i32, i32
  }
  func.func @transform_3(%arg0: i32) -> (i32, i32) {
    %c0_i32 = arith.constant 0 : i32
    %c0_i32_0 = arith.constant 0 : i32
    %c0_i32_1 = arith.constant 0 : i32
    return %c0_i32, %c0_i32_0 : i32, i32
  }
  func.func @transform_4(%arg0: i32) -> (i32, i32) {
    %c0_i32 = arith.constant 0 : i32
    %c0_i32_0 = arith.constant 0 : i32
    return %arg0, %c0_i32 : i32, i32
  }
  func.func @transform_5(%arg0: i32) -> (i32, i32, i32) {
    %c0_i32 = arith.constant 0 : i32
    %c0_i32_0 = arith.constant 0 : i32
    %c0_i32_1 = arith.constant 0 : i32
    return %arg0, %c0_i32, %c0_i32_0 : i32, i32, i32
  }
}

</mosaic_0001>

<bundles_post_ra>
// kernel: tpu_custom_call.1
= control target key start
LH: loop header
LB: loop body
LE: loop exit
PB: predicated region body
PF: predicated region fallthrough
CT: control target
= control target key end

     0   :  { %11 = vsyncpa [#allocation3], 0  ;;  %s1853_s0 = inlined_call_operand.hbm [shape: f32[16,4,128], index: 0, kind: input, shape index: {}]   ;;  %s1854_s1 = inlined_call_operand.hbm [shape: f32[128,128], index: 1, kind: input, shape index: {}]   ;;  %s1855_s2 = inlined_call_operand.vmem [shape: f32[1,128], index: 2, kind: input, shape index: {}]   ;;  %s1856_s3 = inlined_call_operand.hbm [shape: f32[128,128], index: 3, kind: input, shape index: {}]   ;;  %s1857_s4 = inlined_call_operand.hbm [shape: f32[16,128], index: 4, kind: output, shape index: {0}]   ;;  %s1858_s5 = inlined_call_operand.hbm [shape: f32[16,4,128], index: 5, kind: output, shape index: {1}]  }
   0x1   :  { %12 = vsyncpa [#allocation6], 0 }
   0x2   :  { %13 = vsyncpa [#allocation4], 0 }
   0x3   :  { %14 = vsyncpa [#allocation10], 0  ;;  %s1347_s18 = smov [#allocation5]   ;;  %s1229_s22 = scalar_lea.hbm %s1854_s1, 2048 }
   0x4   :  { %s32_s19 = sshll.u32 %s1347_s18, 4  ;;  %p1230_p0 = scmp.ne.s32.totalorder %s1854_s1, %s1229_s22  ;;  %s33_s19 = int_to_ptr.vmem [resolvable:$true] %s32_s19 }
   0x5   :  { %p1233_p1 = scmp.lt.u32.totalorder %s1229_s22, %s1854_s1 }
   0x7   :  { %p1235_p2 = pnand %p1233_p1, %p1230_p0 }
   0x9   :  { %1238 = shalt.err (!%p1235_p2)
}
   0xa   :  { %s1239_s27 = scalar_lea.vmem %s33_s19, 2048  ;;  %p1244_p4 = scmp.lt.s32.totalorder %s33_s19, %s33_s19 }
   0xb   :  { %p1240_p3 = scmp.ne.s32.totalorder %s33_s19, %s1239_s27  ;;  %p1245_p5 = scmp.lt.s32.totalorder %s1239_s27, %s1239_s27 }
   0xd   :  { %p1246_p6 = por %p1245_p5, %p1244_p4 }
   0xf   :  { %p1247_p7 = pnand %p1246_p6, %p1240_p3 }
  0x11   :  { %1250 = shalt.err (!%p1247_p7)
}
  0x12   :  { %s1348_s28 = smov 128   ;;  %s1349_s29 = smov 8  }
  0x13   :  { %38 = dma.hbm_to_vmem [thread:$0]  %s1854_s1, 2048, %s33_s19, [#allocation6], %s1348_s28, %s1348_s28, %s1349_s29  }
  0x14   :  { %s1350_s7 = smov [#allocation2]   ;;  %s1251_s11 = scalar_lea.hbm %s1853_s0, 1024 }
  0x15   :  { %s20_s8 = sshll.u32 %s1350_s7, 4  ;;  %p1252_p8 = scmp.ne.s32.totalorder %s1853_s0, %s1251_s11  ;;  %s21_s8 = int_to_ptr.vmem [resolvable:$true] %s20_s8 }
  0x16   :  { %p1255_p9 = scmp.lt.u32.totalorder %s1251_s11, %s1853_s0 }
  0x18   :  { %p1257_p10 = pnand %p1255_p9, %p1252_p8 }
  0x1a   :  { %1260 = shalt.err (!%p1257_p10)
}
  0x1b   :  { %s1261_s16 = scalar_lea.vmem %s21_s8, 1024  ;;  %p1266_p12 = scmp.lt.s32.totalorder %s21_s8, %s21_s8 }
  0x1c   :  { %p1262_p11 = scmp.ne.s32.totalorder %s21_s8, %s1261_s16  ;;  %p1267_p13 = scmp.lt.s32.totalorder %s1261_s16, %s1261_s16 }
  0x1e   :  { %p1268_p0 = por %p1267_p13, %p1266_p12 }
  0x20   :  { %p1269_p1 = pnand %p1268_p0, %p1262_p11 }
  0x22   :  { %1272 = shalt.err (!%p1269_p1)
}
  0x23   :  { %s1351_s1 = smov 64   ;;  %s1352_s17 = smov 4  }
  0x24   :  { %26 = dma.hbm_to_vmem [thread:$0]  %s1853_s0, 1024, %s21_s8, [#allocation3], %s1351_s1, %s1351_s1, %s1352_s17  }
  0x25   :  { %s1353_s20 = smov [#allocation7]   ;;  %s1273_s24 = scalar_lea.hbm %s1856_s3, 2048 }
  0x26   :  { %s46_s21 = sshll.u32 %s1353_s20, 4  ;;  %p1274_p2 = scmp.ne.s32.totalorder %s1856_s3, %s1273_s24  ;;  %s47_s21 = int_to_ptr.vmem [resolvable:$true] %s46_s21 }
  0x27   :  { %p1277_p3 = scmp.lt.u32.totalorder %s1273_s24, %s1856_s3 }
  0x29   :  { %p1279_p4 = pnand %p1277_p3, %p1274_p2 }
  0x2b   :  { %1282 = shalt.err (!%p1279_p4)
}
  0x2c   :  { %s1283_s6 = scalar_lea.vmem %s47_s21, 2048  ;;  %p1288_p6 = scmp.lt.s32.totalorder %s47_s21, %s47_s21 }
  0x2d   :  { %p1284_p5 = scmp.ne.s32.totalorder %s47_s21, %s1283_s6  ;;  %p1289_p7 = scmp.lt.s32.totalorder %s1283_s6, %s1283_s6 }
  0x2f   :  { %p1290_p8 = por %p1289_p7, %p1288_p6 }
  0x31   :  { %p1291_p9 = pnand %p1290_p8, %p1284_p5 }
  0x33   :  { %1294 = shalt.err (!%p1291_p9)
}
  0x34   :  { %52 = dma.hbm_to_vmem [thread:$0]  %s1856_s3, 2048, %s47_s21, [#allocation6], %s1348_s28, %s1348_s28, %s1349_s29  }
  0x35   :  { %1339 = dma.done.wait [#allocation3], 1024  }
  0x36   :  { %1340 = vsyncadd [#allocation3], 4294966272 }
  0x37   :  { %1341 = dma.done.wait [#allocation6], 4096  }
  0x38   :  { %1342 = vsyncadd [#allocation6], 4294963200  ;;  %v78_v0 = vld [vmem:[#allocation5] sm:$0xff]  ;;  %v79_v1 = vld [vmem:[#allocation5 + $0x8] sm:$0xff]  ;;  %vm391_vm0 = vcmask 1043456  }
  0x39   :  { %v80_v2 = vld [vmem:[#allocation5 + $0x10] sm:$0xff]  ;;  %v1068_v3 = vpack.c.bf16 %v79_v1, %v78_v0  ;;  %v81_v4 = vld [vmem:[#allocation5 + $0x18] sm:$0xff]  ;;  %v82_v6 = vld [vmem:[#allocation5 + $0x20] sm:$0xff] }
  0x3a   :  { %v1072_v5 = vpack.c.bf16 %v81_v4, %v80_v2  ;;  %v83_v7 = vld [vmem:[#allocation5 + $0x28] sm:$0xff]  ;;  %v1431_v9 = vld [vmem:[#allocation2] sm:$0xf]  ;;  %v1433_v10 = vld [vmem:[#allocation2 + $0x4] sm:$0xf] }
  0x3b   :  { %1069 = vmatprep.subr.bf16.mxu0 %v1068_v3  ;;  %v1076_v8 = vpack.c.bf16 %v83_v7, %v82_v6  ;;  %v84_v11 = vld [vmem:[#allocation5 + $0x30] sm:$0xff]  ;;  %v85_v12 = vld [vmem:[#allocation5 + $0x38] sm:$0xff]  ;;  %v117_v13 = vcombine.low %v1431_v9, %v1433_v10  ;;  %v86_v15 = vld [vmem:[#allocation5 + $0x40] sm:$0xff] }
  0x3c   :  { %1071 = vmatpush3.bf16.msra.mxu0 %v1068_v3  ;;  %v1080_v14 = vpack.c.bf16 %v85_v12, %v84_v11  ;;  %v87_v16 = vld [vmem:[#allocation5 + $0x48] sm:$0xff]  ;;  %v246_v17 = vld [vmem:[#allocation7] sm:$0xff]  ;;  %v248_v19 = vld [vmem:[#allocation7 + $0x10] sm:$0xff] }
  0x3d   :  { %1073 = vmatprep.subr.bf16.mxu0 %v1072_v5  ;;  %1012 = vmatprep.mubr.f32.mxu0 %v117_v13  ;;  %v247_v18 = vld [vmem:[#allocation7 + $0x8] sm:$0xff]  ;;  %v249_v20 = vld [vmem:[#allocation7 + $0x18] sm:$0xff]  ;;  %v1084_v23 = vpack.c.bf16 %v87_v16, %v86_v15  ;;  %v250_v24 = vld [vmem:[#allocation7 + $0x20] sm:$0xff] }
  0x3e   :  { %v1100_v21 = vpack.c.bf16 %v247_v18, %v246_v17  ;;  %v1104_v22 = vpack.c.bf16 %v249_v20, %v248_v19  ;;  %v251_v25 = vld [vmem:[#allocation7 + $0x28] sm:$0xff]  ;;  %v88_v26 = vld [vmem:[#allocation5 + $0x50] sm:$0xff]  ;;  %v89_v27 = vld [vmem:[#allocation5 + $0x58] sm:$0xff] }
  0x3f   :  { %v1108_v28 = vpack.c.bf16 %v251_v25, %v250_v24  ;;  %v1088_v29 = vpack.c.bf16 %v89_v27, %v88_v26  ;;  %v252_v30 = vld [vmem:[#allocation7 + $0x30] sm:$0xff]  ;;  %v253_v31 = vld [vmem:[#allocation7 + $0x38] sm:$0xff]  ;;  %v90_v32 = vld [vmem:[#allocation5 + $0x60] sm:$0xff] }
  0x40   :  { %1075 = vmatpush3.bf16.msra.mxu0 %v1072_v5  ;;  %1101 = vmatprep.subr.bf16.mxu1 %v1100_v21  ;;  %v91_v33 = vld [vmem:[#allocation5 + $0x68] sm:$0xff]  ;;  %v1112_v34 = vpack.c.bf16 %v253_v31, %v252_v30  ;;  %v92_v36 = vld [vmem:[#allocation5 + $0x70] sm:$0xff]  ;;  %v93_v37 = vld [vmem:[#allocation5 + $0x78] sm:$0xff] }
  0x41   :  { %1077 = vmatprep.subr.bf16.mxu0 %v1076_v8  ;;  %1103 = vmatpush3.bf16.msra.mxu1 %v1100_v21  ;;  %v1092_v35 = vpack.c.bf16 %v91_v33, %v90_v32  ;;  %v1096_v38 = vpack.c.bf16 %v93_v37, %v92_v36  ;;  %v1437_v39 = vld [vmem:[#allocation2 + $0x8] sm:$0xf]  ;;  %v1439_v40 = vld [vmem:[#allocation2 + $0xc] sm:$0xf]  ;;  %v1441_v41 = vld [vmem:[#allocation2 + $0x10] sm:$0xf] }
  0x42   :  { %1105 = vmatprep.subr.bf16.mxu1 %v1104_v22  ;;  %v1443_v42 = vld [vmem:[#allocation2 + $0x14] sm:$0xf]  ;;  %v118_v43 = vcombine.low %v1437_v39, %v1439_v40  ;;  %v1449_v45 = vld [vmem:[#allocation2 + $0x18] sm:$0xf]  ;;  %v1451_v46 = vld [vmem:[#allocation2 + $0x1c] sm:$0xf] }
  0x43   :  { %v119_v44 = vcombine.low %v1441_v41, %v1443_v42  ;;  %v1453_v47 = vld [vmem:[#allocation2 + $0x20] sm:$0xf]  ;;  %v1455_v48 = vld [vmem:[#allocation2 + $0x24] sm:$0xf]  ;;  %v120_v49 = vcombine.low %v1449_v45, %v1451_v46  ;;  %v1461_v51 = vld [vmem:[#allocation2 + $0x28] sm:$0xf] }
  0x44   :  { %1079 = vmatpush3.bf16.msra.mxu0 %v1076_v8  ;;  %v121_v50 = vcombine.low %v1453_v47, %v1455_v48  ;;  %v1463_v52 = vld [vmem:[#allocation2 + $0x2c] sm:$0xf]  ;;  %v1465_v53 = vld [vmem:[#allocation2 + $0x30] sm:$0xf]  ;;  %v1467_v54 = vld [vmem:[#allocation2 + $0x34] sm:$0xf] }
  0x45   :  { %1081 = vmatprep.subr.bf16.mxu0 %v1080_v14  ;;  %1107 = vmatpush3.bf16.msra.mxu1 %v1104_v22  ;;  %v122_v55 = vcombine.low %v1461_v51, %v1463_v52  ;;  %v123_v56 = vcombine.low %v1465_v53, %v1467_v54  ;;  %v1473_v57 = vld [vmem:[#allocation2 + $0x38] sm:$0xf]  ;;  %v1475_v58 = vld [vmem:[#allocation2 + $0x3c] sm:$0xf]  ;;  %v254_v60 = vld [vmem:[#allocation7 + $0x40] sm:$0xff] }
  0x46   :  { %1109 = vmatprep.subr.bf16.mxu1 %v1108_v28  ;;  %v124_v59 = vcombine.low %v1473_v57, %v1475_v58  ;;  %v255_v61 = vld [vmem:[#allocation7 + $0x48] sm:$0xff]  ;;  %v256_v63 = vld [vmem:[#allocation7 + $0x50] sm:$0xff]  ;;  %v257_v0 = vld [vmem:[#allocation7 + $0x58] sm:$0xff] }
  0x47   :  { %v1116_v62 = vpack.c.bf16 %v255_v61, %v254_v60  ;;  %v1120_v1 = vpack.c.bf16 %v257_v0, %v256_v63  ;;  %v258_v2 = vld [vmem:[#allocation7 + $0x60] sm:$0xff]  ;;  %v259_v3 = vld [vmem:[#allocation7 + $0x68] sm:$0xff]  ;;  %v260_v5 = vld [vmem:[#allocation7 + $0x70] sm:$0xff] }
  0x48   :  { %1083 = vmatpush3.bf16.msra.mxu0 %v1080_v14  ;;  %v1124_v4 = vpack.c.bf16 %v259_v3, %v258_v2  ;;  %v261_v6 = vld [vmem:[#allocation7 + $0x78] sm:$0xff]  ;;  %v931_v8 = vld [vmem:[%s1855_s2] ss:$0 sm:$0xff]  ;;  %s1354_s2 = smov [#allocation9]  }
  0x49   :  { %1085 = vmatprep.subr.bf16.mxu0 %v1084_v23  ;;  %1111 = vmatpush3.bf16.msra.mxu1 %v1108_v28  ;;  %v1128_v7 = vpack.c.bf16 %v261_v6, %v260_v5  ;;  %s914_s9 = sshll.u32 %s1354_s2, 4  ;;  %s1764_s9 = int_to_ptr.vmem [resolvable:$true] %s914_s9 }
  0x4a   :  { %1113 = vmatprep.subr.bf16.mxu1 %v1112_v34  ;;  %s1295_s10 = scalar_lea.vmem %s1764_s9, 1024  ;;  %p1300_p11 = scmp.lt.s32.totalorder %s1764_s9, %s1764_s9 }
  0x4b   :  { %p1296_p10 = scmp.ne.s32.totalorder %s1764_s9, %s1295_s10  ;;  %p1301_p12 = scmp.lt.s32.totalorder %s1295_s10, %s1295_s10 }
  0x4c   :  { %1087 = vmatpush3.bf16.msra.mxu0 %v1084_v23 }
  0x4d   :  { %1089 = vmatprep.subr.bf16.mxu0 %v1088_v29  ;;  %1115 = vmatpush3.bf16.msra.mxu1 %v1112_v34  ;;  %p1302_p13 = por %p1301_p12, %p1300_p11 }
  0x4e   :  { %1117 = vmatprep.subr.bf16.mxu1 %v1116_v62 }
  0x4f   :  { %p1303_p0 = pnand %p1302_p13, %p1296_p10 }
  0x50   :  { %1091 = vmatpush3.bf16.msra.mxu0 %v1088_v29 }
  0x51   :  { %1093 = vmatprep.subr.bf16.mxu0 %v1092_v35  ;;  %1119 = vmatpush3.bf16.msra.mxu1 %v1116_v62 }
  0x52   :  { %1121 = vmatprep.subr.bf16.mxu1 %v1120_v1 }
  0x54   :  { %1095 = vmatpush3.bf16.msra.mxu0 %v1092_v35 }
  0x55   :  { %1097 = vmatprep.subr.bf16.mxu0 %v1096_v38  ;;  %1123 = vmatpush3.bf16.msra.mxu1 %v1120_v1 }
  0x56   :  { %1125 = vmatprep.subr.bf16.mxu1 %v1124_v4 }
  0x58   :  { %1099 = vmatpush3.bf16.msra.mxu0 %v1096_v38 }
  0x59   :  { %1127 = vmatpush3.bf16.msra.mxu1 %v1124_v4 }
  0x5a   :  { %1129 = vmatprep.subr.bf16.mxu1 %v1128_v7 }
  0x5b   :  { %1013 = vmatmul.mubr.f32.vlgmr.msra.gmra.mrb[0].mxu0 %v118_v43 }
  0x5c   :  { %1015 = vmatprep.mubr.f32.mxu0 %v119_v44 }
  0x5d   :  { %1131 = vmatpush3.bf16.msra.mxu1 %v1128_v7 }
  0x5f   :  { %1016 = vmatmul.mubr.f32.gmra.mrb[2].mxu0 %v120_v49 }
  0x60   :  { %1018 = vmatprep.mubr.f32.mxu0 %v121_v50 }
  0x63   :  { %1019 = vmatmul.mubr.f32.gmra.mrb[4].mxu0 %v122_v55 }
  0x64   :  { %1021 = vmatprep.mubr.f32.mxu0 %v123_v56 }
  0x67   :  { %1022 = vmatmul.mubr.f32.gmra.mrb[6].mxu0 %v124_v59 }
 0x12e   :  { %v1014_v11 = vpop.f32.mrb[0].mxu0 }
 0x12f   :  { %v205_v12 = vadd.f32 %v1014_v11, %v931_v8  ;;  %v199_v13 = vpop.f32.mrb[1].mxu0 }
 0x130   :  { %v200_v14 = vadd.f32 %v931_v8, %v199_v13 }
 0x132   :  { %1149 = vtanh.f32 %v200_v14  ;;  %v1017_v15 = vpop.f32.mrb[2].mxu0 }
 0x133   :  { %1151 = vtanh.f32 %v205_v12  ;;  %v215_v16 = vadd.f32 %v1017_v15, %v931_v8  ;;  %v209_v17 = vpop.f32.mrb[3].mxu0 }
 0x134   :  { %v210_v18 = vadd.f32 %v931_v8, %v209_v17 }
 0x136   :  { %1153 = vtanh.f32 %v210_v18  ;;  %v1020_v19 = vpop.f32.mrb[4].mxu0 }
 0x137   :  { %1155 = vtanh.f32 %v215_v16  ;;  %v225_v20 = vadd.f32 %v1020_v19, %v931_v8  ;;  %v219_v21 = vpop.f32.mrb[5].mxu0 }
 0x138   :  { %v220_v22 = vadd.f32 %v931_v8, %v219_v21 }
 0x13a   :  { %1157 = vtanh.f32 %v220_v22  ;;  %v1023_v23 = vpop.f32.mrb[6].mxu0 }
 0x13b   :  { %1159 = vtanh.f32 %v225_v20  ;;  %v235_v24 = vadd.f32 %v1023_v23, %v931_v8  ;;  %v229_v25 = vpop.f32.mrb[7].mxu0 }
 0x13c   :  { %v1150_v26 = vpop.eup %1149  ;;  %v230_v27 = vadd.f32 %v931_v8, %v229_v25 }
 0x13d   :  { %v1152_v28 = vpop.eup %1151  ;;  %1056 = vmatprep.mubr.f32.mxu1 %v1150_v26 }
 0x13e   :  { %1161 = vtanh.f32 %v230_v27  ;;  %1057 = vmatmul.mubr.f32.vlgmr.msra.gmra.mrb[0].mxu1 %v1152_v28 }
 0x13f   :  { %1163 = vtanh.f32 %v235_v24 }
 0x140   :  { %v1154_v29 = vpop.eup %1153 }
 0x141   :  { %v1156_v30 = vpop.eup %1155  ;;  %1059 = vmatprep.mubr.f32.mxu1 %v1154_v29 }
 0x142   :  { %1060 = vmatmul.mubr.f32.gmra.mrb[2].mxu1 %v1156_v30 }
 0x144   :  { %v1158_v31 = vpop.eup %1157 }
 0x145   :  { %v1160_v32 = vpop.eup %1159  ;;  %1062 = vmatprep.mubr.f32.mxu1 %v1158_v31 }
 0x146   :  { %1063 = vmatmul.mubr.f32.gmra.mrb[4].mxu1 %v1160_v32 }
 0x148   :  { %v1162_v33 = vpop.eup %1161 }
 0x149   :  { %v1164_v34 = vpop.eup %1163  ;;  %1065 = vmatprep.mubr.f32.mxu1 %v1162_v33 }
 0x14a   :  { %1066 = vmatmul.mubr.f32.gmra.mrb[6].mxu1 %v1164_v34 }
 0x211   :  { %v1482_v35 = vpop.f32.mrb[0].mxu1 }
 0x212   :  { %v1486_v36 = vcombine.high %v1482_v35, %v1482_v35  ;;  %v406_v37 = vsel %vm391_vm0, %v1482_v35, -inf  ;;  %v1490_v38 = vpop.f32.mrb[1].mxu1 }
 0x213   :  { %v407_v43 = vrot.slane %v406_v37, 4  ;;  %v1494_v44 = vcombine.high %v1490_v38, %v1490_v38  ;;  %v392_v49 = vsel %vm391_vm0, %v1490_v38, -inf }
 0x214   :  { %v413_v50 = vsel %vm391_vm0, %v1486_v36, -inf  ;;  %v393_v55 = vrot.slane %v392_v49, 4 }
 0x215   :  { %v408_v56 = vmax.f32 %v406_v37, %v407_v43  ;;  %v414_v59 = vrot.slane %v413_v50, 4  ;;  %v399_v60 = vsel %vm391_vm0, %v1494_v44, -inf  ;;  %v1502_v61 = vpop.f32.mrb[2].mxu1 }
 0x216   :  { %v394_v62 = vmax.f32 %v392_v49, %v393_v55  ;;  %v400_v63 = vrot.slane %v399_v60, 4  ;;  %v1506_v0 = vcombine.high %v1502_v61, %v1502_v61  ;;  %v434_v1 = vsel %vm391_vm0, %v1502_v61, -inf  ;;  %v1510_v2 = vpop.f32.mrb[3].mxu1 }
 0x217   :  { %v409_v3 = vrot.slane %v408_v56, 2  ;;  %v415_v4 = vmax.f32 %v413_v50, %v414_v59  ;;  %v435_v5 = vrot.slane %v434_v1, 4  ;;  %v1514_v6 = vcombine.high %v1510_v2, %v1510_v2 }
 0x218   :  { %v395_v7 = vrot.slane %v394_v62, 2  ;;  %v401_v8 = vmax.f32 %v399_v60, %v400_v63  ;;  %v441_v11 = vsel %vm391_vm0, %v1506_v0, -inf  ;;  %v420_v12 = vsel %vm391_vm0, %v1510_v2, -inf }
 0x219   :  { %v410_v13 = vmax.f32 %v408_v56, %v409_v3  ;;  %v416_v14 = vrot.slane %v415_v4, 2  ;;  %v436_v15 = vmax.f32 %v434_v1, %v435_v5  ;;  %v442_v16 = vrot.slane %v441_v11, 4  ;;  %v1520_v17 = vpop.f32.mrb[4].mxu1 }
 0x21a   :  { %v396_v18 = vmax.f32 %v394_v62, %v395_v7  ;;  %v402_v19 = vrot.slane %v401_v8, 2  ;;  %v421_v20 = vrot.slane %v420_v12, 4  ;;  %v427_v21 = vsel %vm391_vm0, %v1514_v6, -inf  ;;  %v1524_v22 = vpop.f32.mrb[5].mxu1 }
 0x21b   :  { %v411_v23 = vrot.slane %v410_v13, 1  ;;  %v417_v24 = vmax.f32 %v415_v4, %v416_v14  ;;  %v437_v25 = vrot.slane %v436_v15, 2  ;;  %v443_v26 = vmax.f32 %v441_v11, %v442_v16 }
 0x21c   :  { %v397_v27 = vrot.slane %v396_v18, 1  ;;  %v403_v28 = vmax.f32 %v401_v8, %v402_v19  ;;  %v422_v29 = vmax.f32 %v420_v12, %v421_v20  ;;  %v428_v30 = vrot.slane %v427_v21, 4 }
 0x21d   :  { %v412_v31 = vmax.f32 %v410_v13, %v411_v23  ;;  %v418_v32 = vrot.slane %v417_v24, 1  ;;  %v438_v33 = vmax.f32 %v436_v15, %v437_v25  ;;  %v444_v34 = vrot.slane %v443_v26, 2  ;;  %v1526_v37 = vpop.f32.mrb[6].mxu1 }
 0x21e   :  { %v398_v43 = vmax.f32 %v396_v18, %v397_v27  ;;  %v404_v49 = vrot.slane %v403_v28, 1  ;;  %v423_v50 = vrot.slane %v422_v29, 2  ;;  %v429_v55 = vmax.f32 %v427_v21, %v428_v30  ;;  %v1528_v56 = vpop.f32.mrb[7].mxu1 }
 0x21f   :  { %v419_v59 = vmax.f32 %v417_v24, %v418_v32  ;;  %v506_v60 = vsub.f32 %v1482_v35, %v412_v31  ;;  %v439_v62 = vrot.slane %v438_v33, 1  ;;  %v445_v63 = vmax.f32 %v443_v26, %v444_v34 }
 0x220   :  { %v405_v1 = vmax.f32 %v403_v28, %v404_v49  ;;  %v504_v3 = vsub.f32 %v1490_v38, %v398_v43  ;;  %v424_v4 = vmax.f32 %v422_v29, %v423_v50  ;;  %v430_v5 = vrot.slane %v429_v55, 2 }
 0x221   :  { %v507_v7 = vsub.f32 %v1486_v36, %v419_v59  ;;  %v524_v8 = vmul.f32 1.442695, %v506_v60  ;;  %v440_v11 = vmax.f32 %v438_v33, %v439_v62  ;;  %v446_v12 = vrot.slane %v445_v63, 1 }
 0x222   :  { %v505_v13 = vsub.f32 %v1494_v44, %v405_v1  ;;  %v520_v14 = vmul.f32 1.442695, %v504_v3  ;;  %v425_v15 = vrot.slane %v424_v4, 1  ;;  %v431_v16 = vmax.f32 %v429_v55, %v430_v5 }
 0x223   :  { %1165 = vpow2.f32 %v524_v8  ;;  %v526_v18 = vmul.f32 1.442695, %v507_v7  ;;  %v510_v35 = vsub.f32 %v1502_v61, %v440_v11  ;;  %v447_v21 = vmax.f32 %v445_v63, %v446_v12 }
 0x224   :  { %1167 = vpow2.f32 %v520_v14  ;;  %v522_v19 = vmul.f32 1.442695, %v505_v13  ;;  %v426_v20 = vmax.f32 %v424_v4, %v425_v15  ;;  %v432_v38 = vrot.slane %v431_v16, 1 }
 0x225   :  { %1169 = vpow2.f32 %v526_v18  ;;  %v1537_v36 = vcombine.high %v1520_v17, %v1520_v17  ;;  %v462_v24 = vsel %vm391_vm0, %v1520_v17, -inf  ;;  %v532_v25 = vmul.f32 1.442695, %v510_v35 }
 0x226   :  { %1171 = vpow2.f32 %v522_v19  ;;  %v433_v23 = vmax.f32 %v431_v16, %v432_v38  ;;  %v508_v44 = vsub.f32 %v1510_v2, %v426_v20  ;;  %v463_v26 = vrot.slane %v462_v24, 4 }
 0x227   :  { %v469_v61 = vsel %vm391_vm0, %v1537_v36, -inf  ;;  %v1547_v30 = vcombine.high %v1524_v22, %v1524_v22  ;;  %v511_v31 = vsub.f32 %v1506_v0, %v447_v21  ;;  %v448_v2 = vsel %vm391_vm0, %v1524_v22, -inf }
 0x228   :  { %v509_v27 = vsub.f32 %v1514_v6, %v433_v23  ;;  %v528_v28 = vmul.f32 1.442695, %v508_v44  ;;  %v470_v29 = vrot.slane %v469_v61, 4  ;;  %v464_v32 = vmax.f32 %v462_v24, %v463_v26 }
 0x229   :  { %v1554_v33 = vcombine.high %v1526_v37, %v1526_v37  ;;  %v449_v6 = vrot.slane %v448_v2, 4  ;;  %v455_v50 = vsel %vm391_vm0, %v1547_v30, -inf  ;;  %v1560_v55 = vsel %vm391_vm0, %v1526_v37, -inf }
 0x22a   :  { %1173 = vpow2.f32 %v528_v28  ;;  %v530_v34 = vmul.f32 1.442695, %v509_v27  ;;  %v471_v43 = vmax.f32 %v469_v61, %v470_v29  ;;  %v465_v49 = vrot.slane %v464_v32, 2 }
 0x22b   :  { %v1564_v0 = vsel %vm391_vm0, %v1554_v33, -inf  ;;  %1175 = vpow2.f32 %v532_v25  ;;  %v450_v60 = vmax.f32 %v448_v2, %v449_v6  ;;  %v456_v62 = vrot.slane %v455_v50, 4 }
 0x22c   :  { %v472_v59 = vrot.slane %v471_v43, 2  ;;  %v1568_v1 = vmul.f32 1.442695, %v511_v31  ;;  %1177 = vpow2.f32 %v530_v34  ;;  %v466_v3 = vmax.f32 %v464_v32, %v465_v49 }
 0x22d   :  { %v1566_v63 = vpop.eup %1165  ;;  %v491_v4 = vrot.slane %v1560_v55, 4  ;;  %v451_v11 = vrot.slane %v450_v60, 2  ;;  %v498_v12 = vrot.slane %v1564_v0, 4  ;;  %v457_v18 = vmax.f32 %v455_v50, %v456_v62 }
 0x22e   :  { %v1571_v5 = vpop.eup %1167  ;;  %v566_v7 = vsel %vm391_vm0, %v1566_v63, 0.0  ;;  %v473_v8 = vmax.f32 %v471_v43, %v472_v59  ;;  %v467_v16 = vrot.slane %v466_v3, 1  ;;  %v1588_v25 = vcombine.high %v1528_v56, %v1528_v56 }
 0x22f   :  { %v1576_v13 = vpop.eup %1169  ;;  %v567_v14 = vrot.slane %v566_v7, 4  ;;  %v552_v15 = vsel %vm391_vm0, %v1571_v5, 0.0  ;;  %v452_v21 = vmax.f32 %v450_v60, %v451_v11  ;;  %v458_v2 = vrot.slane %v457_v18, 2 }
 0x230   :  { %v1580_v35 = vpop.eup %1171  ;;  %v573_v19 = vsel %vm391_vm0, %v1576_v13, 0.0  ;;  %v553_v20 = vrot.slane %v552_v15, 4  ;;  %v474_v38 = vrot.slane %v473_v8, 1  ;;  %v468_v27 = vmax.f32 %v466_v3, %v467_v16 }
 0x231   :  { %v568_v23 = vadd.f32 %v567_v14, %v566_v7  ;;  %v574_v44 = vrot.slane %v573_v19, 4  ;;  %v559_v24 = vsel %vm391_vm0, %v1580_v35, 0.0  ;;  %v453_v32 = vrot.slane %v452_v21, 1 }
 0x232   :  { %v554_v26 = vadd.f32 %v553_v20, %v552_v15  ;;  %v560_v61 = vrot.slane %v559_v24, 4  ;;  %v475_v28 = vmax.f32 %v473_v8, %v474_v38  ;;  %v514_v49 = vsub.f32 %v1520_v17, %v468_v27 }
 0x233   :  { %v569_v29 = vrot.slane %v568_v23, 2  ;;  %v575_v31 = vadd.f32 %v574_v44, %v573_v19  ;;  %v454_v62 = vmax.f32 %v452_v21, %v453_v32  ;;  %v459_v7 = vmax.f32 %v457_v18, %v458_v2 }
 0x234   :  { %v1590_v34 = vpop.eup %1173  ;;  %v555_v43 = vrot.slane %v554_v26, 2  ;;  %v561_v6 = vadd.f32 %v560_v61, %v559_v24  ;;  %v515_v50 = vsub.f32 %v1537_v36, %v475_v28  ;;  %v540_v15 = vmul.f32 1.442695, %v514_v49 }
 0x235   :  { %v570_v59 = vadd.f32 %v569_v29, %v568_v23  ;;  %v580_v60 = vsel %vm391_vm0, %v1590_v34, 0.0  ;;  %v1596_v3 = vpop.eup %1175  ;;  %v460_v38 = vrot.slane %v459_v7, 1  ;;  %v512_v17 = vsub.f32 %v1524_v22, %v454_v62 }
 0x236   :  { %v556_v8 = vadd.f32 %v555_v43, %v554_v26  ;;  %v562_v11 = vrot.slane %v561_v6, 2  ;;  %v581_v14 = vrot.slane %v580_v60, 4  ;;  %v1598_v16 = vpop.eup %1177  ;;  %v542_v20 = vmul.f32 1.442695, %v515_v50 }
 0x237   :  { %v571_v19 = vrot.slane %v570_v59, 1  ;;  %1179 = vpow2.f32 %v540_v15  ;;  %v461_v18 = vmax.f32 %v459_v7, %v460_v38  ;;  %v536_v21 = vmul.f32 1.442695, %v512_v17 }
 0x238   :  { %v557_v36 = vrot.slane %v556_v8, 1  ;;  %v563_v23 = vadd.f32 %v562_v11, %v561_v6  ;;  %v582_v44 = vadd.f32 %v581_v14, %v580_v60  ;;  %1181 = vpow2.f32 %v542_v20 }
 0x239   :  { %v572_v24 = vadd.f32 %v571_v19, %v570_v59  ;;  %v492_v27 = vmax.f32 %v1560_v55, %v491_v4  ;;  %v499_v28 = vmax.f32 %v1564_v0, %v498_v12  ;;  %v513_v29 = vsub.f32 %v1547_v30, %v461_v18 }
 0x23a   :  { %v558_v61 = vadd.f32 %v557_v36, %v556_v8  ;;  %v564_v26 = vrot.slane %v563_v23, 1  ;;  %v476_v22 = vsel %vm391_vm0, %v1528_v56, -inf  ;;  %v483_v32 = vsel %vm391_vm0, %v1588_v25, -inf }
 0x23b   :  { %1183 = vrcp.f32 %v572_v24  ;;  %v493_v43 = vrot.slane %v492_v27, 2  ;;  %v500_v6 = vrot.slane %v499_v28, 2  ;;  %v538_v49 = vmul.f32 1.442695, %v513_v29 }
 0x23c   :  { %v565_v2 = vadd.f32 %v564_v26, %v563_v23  ;;  %1185 = vrcp.f32 %v558_v61  ;;  %v477_v50 = vrot.slane %v476_v22, 4  ;;  %v484_v59 = vrot.slane %v483_v32, 4 }
 0x23d   :  { %1187 = vpow2.f32 %v536_v21  ;;  %v494_v55 = vmax.f32 %v492_v27, %v493_v43  ;;  %v501_v0 = vmax.f32 %v499_v28, %v500_v6  ;;  %v576_v4 = vrot.slane %v575_v31, 2 }
 0x23e   :  { %1189 = vrcp.f32 %v565_v2  ;;  %v478_v30 = vmax.f32 %v476_v22, %v477_v50  ;;  %v485_v12 = vmax.f32 %v483_v32, %v484_v59  ;;  %v583_v60 = vrot.slane %v582_v44, 2 }
 0x23f   :  { %1191 = vpow2.f32 %v538_v49  ;;  %v495_v62 = vrot.slane %v494_v55, 1  ;;  %v502_v7 = vrot.slane %v501_v0, 1  ;;  %v587_v8 = vsel %vm391_vm0, %v1598_v16, 0.0 }
 0x240   :  { %1193 = vpow2.f32 %v1568_v1  ;;  %v479_v11 = vrot.slane %v478_v30, 2  ;;  %v486_v14 = vrot.slane %v485_v12, 2  ;;  %v577_v15 = vadd.f32 %v576_v4, %v575_v31 }
 0x241   :  { %v1611_v19 = vpop.eup %1179  ;;  %v496_v20 = vmax.f32 %v494_v55, %v495_v62  ;;  %v503_v38 = vmax.f32 %v501_v0, %v502_v7  ;;  %v1613_v17 = vadd.f32 %v583_v60, %v582_v44  ;;  %v588_v18 = vrot.slane %v587_v8, 4 }
 0x242   :  { %v1615_v36 = vpop.eup %1181  ;;  %v622_v23 = vsel %vm391_vm0, %v1611_v19, 0.0  ;;  %v480_v1 = vmax.f32 %v478_v30, %v479_v11  ;;  %v487_v24 = vmax.f32 %v485_v12, %v486_v14  ;;  %v578_v29 = vrot.slane %v577_v15, 1 }
 0x243   :  { %v623_v21 = vrot.slane %v622_v23, 4  ;;  %v629_v61 = vsel %vm391_vm0, %v1615_v36, 0.0  ;;  %v518_v31 = vsub.f32 %v1526_v37, %v496_v20  ;;  %v519_v26 = vsub.f32 %v1554_v33, %v503_v38 }
 0x244   :  { %v481_v44 = vrot.slane %v480_v1, 1  ;;  %v488_v28 = vrot.slane %v487_v24, 1  ;;  %v594_v22 = vsel %vm391_vm0, %v1596_v3, 0.0  ;;  %v630_v33 = vrot.slane %v629_v61, 4 }
 0x245   :  { %v1623_v27 = vpop.eup %1183  ;;  %v624_v43 = vadd.f32 %v623_v21, %v622_v23  ;;  %v548_v6 = vmul.f32 1.442695, %v518_v31  ;;  %v550_v49 = vmul.f32 1.442695, %v519_v26  ;;  %v585_v12 = vrot.slane %v1613_v17, 1 }
 0x246   :  { %v1627_v32 = vpop.eup %1185  ;;  %v682_v2 = vmul.f32 %v1623_v27, %v1566_v63  ;;  %v482_v59 = vmax.f32 %v480_v1, %v481_v44  ;;  %v489_v55 = vmax.f32 %v487_v24, %v488_v28  ;;  %v579_v1 = vadd.f32 %v578_v29, %v577_v15 }
 0x247   :  { %v1631_v50 = vpop.eup %1187  ;;  %v680_v37 = vmul.f32 %v1627_v32, %v1571_v5  ;;  %v625_v4 = vrot.slane %v624_v43, 2  ;;  %1195 = vpow2.f32 %v548_v6  ;;  %v631_v24 = vadd.f32 %v630_v33, %v629_v61 }
 0x248   :  { %v1635_v0 = vpop.eup %1189  ;;  %698 = vst [vmem:[#allocation9 + $0x8] sm:$0xf] %v682_v2  ;;  %v608_v30 = vsel %vm391_vm0, %v1631_v50, 0.0  ;;  %1197 = vpow2.f32 %v550_v49  ;;  %v516_v11 = vsub.f32 %v1528_v56, %v482_v59  ;;  %v517_v23 = vsub.f32 %v1588_v25, %v489_v55 }
 0x249   :  { %v1640_v60 = vpop.eup %1191  ;;  %v681_v62 = vmul.f32 %v1635_v0, %v1580_v35  ;;  %696 = vst [vmem:[#allocation9] sm:$0xf] %v680_v37  ;;  %v609_v7 = vrot.slane %v608_v30, 4  ;;  %v626_v20 = vadd.f32 %v625_v4, %v624_v43  ;;  %v589_v2 = vadd.f32 %v588_v18, %v587_v8 }
 0x24a   :  { %v1645_v14 = vpop.eup %1193  ;;  %v615_v38 = vsel %vm391_vm0, %v1640_v60, 0.0  ;;  %v544_v26 = vmul.f32 1.442695, %v516_v11  ;;  %v546_v28 = vmul.f32 1.442695, %v517_v23  ;;  %v595_v6 = vrot.slane %v594_v22, 4 }
 0x24b   :  { %697 = vst [vmem:[#allocation9 + $0x4] sm:$0xf] %v681_v62  ;;  %v610_v21 = vadd.f32 %v609_v7, %v608_v30  ;;  %v616_v31 = vrot.slane %v615_v38, 4  ;;  %v627_v44 = vrot.slane %v626_v20, 1  ;;  %v601_v43 = vsel %vm391_vm0, %v1645_v14, 0.0 }
 0x24c   :  { %1199 = vpow2.f32 %v544_v26  ;;  %v590_v59 = vrot.slane %v589_v2, 2  ;;  %v596_v25 = vadd.f32 %v595_v6, %v594_v22  ;;  %v602_v61 = vrot.slane %v601_v43, 4 }
 0x24d   :  { %v611_v49 = vrot.slane %v610_v21, 2  ;;  %v617_v56 = vadd.f32 %v616_v31, %v615_v38  ;;  %v628_v37 = vadd.f32 %v627_v44, %v626_v20  ;;  %1201 = vpow2.f32 %v546_v28 }
 0x24e   :  { %v632_v33 = vrot.slane %v631_v24, 2  ;;  %v591_v55 = vadd.f32 %v590_v59, %v589_v2  ;;  %v597_v4 = vrot.slane %v596_v25, 2  ;;  %v603_v18 = vadd.f32 %v602_v61, %v601_v43 }
 0x24f   :  { %v612_v15 = vadd.f32 %v611_v49, %v610_v21  ;;  %v618_v29 = vrot.slane %v617_v56, 2  ;;  %1203 = vrcp.f32 %v628_v37  ;;  %v586_v11 = vadd.f32 %v585_v12, %v1613_v17 }
 0x250   :  { %v633_v62 = vadd.f32 %v632_v33, %v631_v24  ;;  %v592_v38 = vrot.slane %v591_v55, 1  ;;  %v598_v20 = vadd.f32 %v597_v4, %v596_v25  ;;  %1205 = vrcp.f32 %v579_v1 }
 0x251   :  { %v613_v30 = vrot.slane %v612_v15, 1  ;;  %v619_v8 = vadd.f32 %v618_v29, %v617_v56  ;;  %v1652_v7 = vpop.eup %1195  ;;  %v604_v31 = vrot.slane %v603_v18, 2 }
 0x252   :  { %v1655_v23 = vpop.eup %1197  ;;  %v634_v26 = vrot.slane %v633_v62, 1  ;;  %v593_v44 = vadd.f32 %v592_v38, %v591_v55  ;;  %v599_v28 = vrot.slane %v598_v20, 1  ;;  %v650_v2 = vsel %vm391_vm0, %v1652_v7, 0.0 }
 0x253   :  { %v614_v22 = vadd.f32 %v613_v30, %v612_v15  ;;  %v620_v21 = vrot.slane %v619_v8, 1  ;;  %v657_v24 = vsel %vm391_vm0, %v1655_v23, 0.0  ;;  %v605_v17 = vadd.f32 %v604_v31, %v603_v18 }
 0x254   :  { %v635_v12 = vadd.f32 %v634_v26, %v633_v62  ;;  %v600_v49 = vadd.f32 %v599_v28, %v598_v20  ;;  %v651_v1 = vrot.slane %v650_v2, 4  ;;  %v658_v56 = vrot.slane %v657_v24, 4 }
 0x255   :  { %v621_v6 = vadd.f32 %v620_v21, %v619_v8  ;;  %1207 = vrcp.f32 %v614_v22  ;;  %v606_v37 = vrot.slane %v605_v17, 1  ;;  %v712_v62 = vmul.f32 %v1571_v5, %v1431_v9 }
 0x256   :  { %1209 = vrcp.f32 %v586_v11  ;;  %v1661_v43 = vpop.eup %1199  ;;  %v652_v15 = vadd.f32 %v651_v1, %v650_v2  ;;  %v659_v29 = vadd.f32 %v658_v56, %v657_v24  ;;  %v713_v22 = vmul.f32 %v1580_v35, %v1433_v10 }
 0x257   :  { %1211 = vrcp.f32 %v621_v6  ;;  %v1663_v59 = vpop.eup %1201  ;;  %v636_v25 = vsel %vm391_vm0, %v1661_v43, 0.0  ;;  %v607_v55 = vadd.f32 %v606_v37, %v605_v17  ;;  %v714_v9 = vmul.f32 %v1566_v63, %v1437_v39 }
 0x258   :  { %1213 = vrcp.f32 %v593_v44  ;;  %v637_v61 = vrot.slane %v636_v25, 4  ;;  %v643_v33 = vsel %vm391_vm0, %v1663_v59, 0.0  ;;  %v653_v8 = vrot.slane %v652_v15, 2 }
 0x259   :  { %1215 = vrcp.f32 %v600_v49  ;;  %v1669_v4 = vpop.eup %1203  ;;  %v644_v30 = vrot.slane %v643_v33, 4  ;;  %v660_v18 = vrot.slane %v659_v29, 2  ;;  %v715_v5 = vmul.f32 %v1576_v13, %v1439_v40 }
 0x25a   :  { %1217 = vrcp.f32 %v635_v12  ;;  %v690_v11 = vmul.f32 %v1669_v4, %v1611_v19  ;;  %v638_v38 = vadd.f32 %v637_v61, %v636_v25  ;;  %v1675_v20 = vpop.eup %1205  ;;  %v654_v31 = vadd.f32 %v653_v8, %v652_v15 }
 0x25b   :  { %1219 = vrcp.f32 %v607_v55  ;;  %v645_v21 = vadd.f32 %v644_v30, %v643_v33  ;;  %v661_v26 = vadd.f32 %v660_v18, %v659_v29  ;;  %v683_v28 = vmul.f32 %v1675_v20, %v1576_v13 }
 0x25c   :  { %706 = vst [vmem:[#allocation9 + $0x28] sm:$0xf] %v690_v11  ;;  %v639_v44 = vrot.slane %v638_v38, 2  ;;  %v655_v24 = vrot.slane %v654_v31, 1  ;;  %v716_v10 = vmul.f32 %v1590_v34, %v1441_v41  ;;  %v717_v12 = vmul.f32 %v1598_v16, %v1443_v42 }
 0x25d   :  { %v646_v2 = vrot.slane %v645_v21, 2  ;;  %v662_v6 = vrot.slane %v661_v26, 1  ;;  %699 = vst [vmem:[#allocation9 + $0xc] sm:$0xf] %v683_v28  ;;  %v718_v49 = vmul.f32 %v1596_v3, %v1449_v45  ;;  %v719_v39 = vmul.f32 %v1645_v14, %v1451_v46 }
 0x25e   :  { %v640_v17 = vadd.f32 %v639_v44, %v638_v38  ;;  %v656_v41 = vadd.f32 %v655_v24, %v654_v31  ;;  %v728_v25 = vsel %vm391_vm0, %v712_v62, 0.0  ;;  %v735_v45 = vsel %vm391_vm0, %v713_v22, 0.0 }
 0x25f   :  { %v1687_v35 = vpop.eup %1207  ;;  %v647_v13 = vadd.f32 %v646_v2, %v645_v21  ;;  %v663_v1 = vadd.f32 %v662_v6, %v661_v26  ;;  %v729_v61 = vrot.slane %v728_v25, 4  ;;  %v736_v30 = vrot.slane %v735_v45, 4 }
 0x260   :  { %v1695_v40 = vpop.eup %1209  ;;  %v688_v63 = vmul.f32 %v1687_v35, %v1631_v50  ;;  %v641_v37 = vrot.slane %v640_v17, 1  ;;  %1221 = vrcp.f32 %v656_v41  ;;  %v742_v38 = vsel %vm391_vm0, %v714_v9, 0.0 }
 0x261   :  { %v1699_v56 = vpop.eup %1211  ;;  %v684_v42 = vmul.f32 %v1695_v40, %v1590_v34  ;;  %v648_v29 = vrot.slane %v647_v13, 1  ;;  %1223 = vrcp.f32 %v663_v1  ;;  %v730_v11 = vadd.f32 %v729_v61, %v728_v25 }
 0x262   :  { %v1705_v15 = vpop.eup %1213  ;;  %v689_v46 = vmul.f32 %v1699_v56, %v1640_v60  ;;  %704 = vst [vmem:[#allocation9 + $0x20] sm:$0xf] %v688_v63  ;;  %v642_v55 = vadd.f32 %v641_v37, %v640_v17  ;;  %v743_v31 = vrot.slane %v742_v38, 4  ;;  %v756_v24 = vsel %vm391_vm0, %v716_v10, 0.0 }
 0x263   :  { %v1709_v33 = vpop.eup %1215  ;;  %v685_v34 = vmul.f32 %v1705_v15, %v1598_v16  ;;  %700 = vst [vmem:[#allocation9 + $0x10] sm:$0xf] %v684_v42  ;;  %v649_v18 = vadd.f32 %v648_v29, %v647_v13  ;;  %v737_v16 = vadd.f32 %v736_v30, %v735_v45  ;;  %v731_v44 = vrot.slane %v730_v11, 2 }
 0x264   :  { %v1713_v8 = vpop.eup %1217  ;;  %705 = vst [vmem:[#allocation9 + $0x24] sm:$0xf] %v689_v46  ;;  %v686_v62 = vmul.f32 %v1709_v33, %v1596_v3  ;;  %1225 = vrcp.f32 %v642_v55  ;;  %v749_v3 = vsel %vm391_vm0, %v715_v5, 0.0  ;;  %v744_v9 = vadd.f32 %v743_v31, %v742_v38 }
 0x265   :  { %v1718_v22 = vpop.eup %1219  ;;  %v691_v21 = vmul.f32 %v1713_v8, %v1615_v36  ;;  %701 = vst [vmem:[#allocation9 + $0x14] sm:$0xf] %v685_v34  ;;  %1227 = vrcp.f32 %v649_v18  ;;  %v738_v28 = vrot.slane %v737_v16, 2  ;;  %v750_v2 = vrot.slane %v749_v3, 4 }
 0x266   :  { %v687_v26 = vmul.f32 %v1718_v22, %v1645_v14  ;;  %702 = vst [vmem:[#allocation9 + $0x18] sm:$0xf] %v686_v62  ;;  %v720_v6 = vmul.f32 %v1631_v50, %v1453_v47  ;;  %v757_v17 = vrot.slane %v756_v24, 4  ;;  %v763_v63 = vsel %vm391_vm0, %v717_v12, 0.0 }
 0x267   :  { %707 = vst [vmem:[#allocation9 + $0x2c] sm:$0xf] %v691_v21  ;;  %v770_v13 = vsel %vm391_vm0, %v718_v49, 0.0  ;;  %v732_v14 = vadd.f32 %v731_v44, %v730_v11  ;;  %v745_v41 = vrot.slane %v744_v9, 2  ;;  %v751_v1 = vadd.f32 %v750_v2, %v749_v3 }
 0x268   :  { %703 = vst [vmem:[#allocation9 + $0x1c] sm:$0xf] %v687_v26  ;;  %v764_v37 = vrot.slane %v763_v63, 4  ;;  %v721_v5 = vmul.f32 %v1640_v60, %v1455_v48  ;;  %v739_v42 = vadd.f32 %v738_v28, %v737_v16  ;;  %v758_v25 = vadd.f32 %v757_v17, %v756_v24 }
 0x269   :  { %v771_v45 = vrot.slane %v770_v13, 4  ;;  %v722_v10 = vmul.f32 %v1611_v19, %v1461_v51  ;;  %v746_v47 = vadd.f32 %v745_v41, %v744_v9  ;;  %v752_v50 = vrot.slane %v751_v1, 2 }
 0x26a   :  { %v777_v46 = vsel %vm391_vm0, %v719_v39, 0.0  ;;  %v1735_v12 = vpop.eup %1221  ;;  %v723_v49 = vmul.f32 %v1615_v36, %v1463_v52  ;;  %v759_v29 = vrot.slane %v758_v25, 2  ;;  %v765_v61 = vadd.f32 %v764_v37, %v763_v63 }
 0x26b   :  { %v772_v55 = vadd.f32 %v771_v45, %v770_v13  ;;  %v1739_v34 = vpop.eup %1223  ;;  %v694_v48 = vmul.f32 %v1735_v12, %v1652_v7  ;;  %v724_v51 = vmul.f32 %v1661_v43, %v1465_v53  ;;  %v733_v19 = vrot.slane %v732_v14, 1 }
 0x26c   :  { %v753_v60 = vadd.f32 %v752_v50, %v751_v1  ;;  %v695_v39 = vmul.f32 %v1739_v34, %v1655_v23  ;;  %v740_v30 = vrot.slane %v739_v42, 1  ;;  %v747_v18 = vrot.slane %v746_v47, 1 }
 0x26d   :  { %v778_v62 = vrot.slane %v777_v46, 4  ;;  %710 = vst [vmem:[#allocation9 + $0x38] sm:$0xf] %v694_v48  ;;  %v725_v36 = vmul.f32 %v1663_v59, %v1467_v54  ;;  %v726_v11 = vmul.f32 %v1652_v7, %v1473_v57  ;;  %v760_v53 = vadd.f32 %v759_v29, %v758_v25 }
 0x26e   :  { %v1747_v52 = vpop.eup %1225  ;;  %v784_v38 = vsel %vm391_vm0, %v720_v6, 0.0  ;;  %711 = vst [vmem:[#allocation9 + $0x3c] sm:$0xf] %v695_v39  ;;  %v727_v31 = vmul.f32 %v1655_v23, %v1475_v58  ;;  %v766_v26 = vrot.slane %v765_v61, 2  ;;  %v773_v44 = vrot.slane %v772_v55, 2 }
 0x26f   :  { %v1754_v21 = vpop.eup %1227  ;;  %v692_v16 = vmul.f32 %v1747_v52, %v1661_v43  ;;  %v1762_v3 = vadd.f32 %v733_v19, %v732_v14  ;;  %v754_v57 = vrot.slane %v753_v60, 1  ;;  %v785_v7 = vrot.slane %v784_v38, 4 }
 0x270   :  { %v693_v54 = vmul.f32 %v1754_v21, %v1663_v59  ;;  %v1766_v43 = vadd.f32 %v740_v30, %v739_v42  ;;  %v1768_v28 = vadd.f32 %v747_v18, %v746_v47  ;;  %v779_v58 = vadd.f32 %v778_v62, %v777_v46 }
 0x271   :  { %708 = vst [vmem:[#allocation9 + $0x30] sm:$0xf] %v692_v16  ;;  %v791_v23 = vsel %vm391_vm0, %v721_v5, 0.0  ;;  %v761_v9 = vrot.slane %v760_v53, 1  ;;  %v786_v59 = vadd.f32 %v785_v7, %v784_v38  ;;  %v798_v24 = vsel %vm391_vm0, %v722_v10, 0.0 }
 0x272   :  { %709 = vst [vmem:[#allocation9 + $0x34] sm:$0xf] %v693_v54  ;;  %v792_v2 = vrot.slane %v791_v23, 4  ;;  %v1772_v6 = vadd.f32 %v766_v26, %v765_v61  ;;  %v1774_v17 = vadd.f32 %v773_v44, %v772_v55  ;;  %v799_v63 = vrot.slane %v798_v24, 4 }
 0x273   :  { %v805_v13 = vsel %vm391_vm0, %v723_v49, 0.0 }
 0x274   :  { %1306 = shalt.err (!%p1303_p0)
}
 0x275   :  { %s1307_s13 = scalar_lea.hbm %s1858_s5, 1024 }
 0x276   :  { %p1308_p1 = scmp.ne.s32.totalorder %s1858_s5, %s1307_s13  ;;  %p1311_p2 = scmp.lt.u32.totalorder %s1307_s13, %s1858_s5 }
 0x278   :  { %p1313_p3 = pnand %p1311_p2, %p1308_p1 }
 0x27a   :  { %1316 = shalt.err (!%p1313_p3)
}
 0x27b   :  { %920 = dma.vmem_to_hbm [thread:$0]  %s1764_s9, 1024, %s1858_s5, [#allocation10], %s1351_s1, %s1351_s1, %s1352_s17   ;;  %v755_v14 = vadd.f32 %v754_v57, %v753_v60  ;;  %v787_v41 = vrot.slane %v786_v59, 2  ;;  %v793_v1 = vadd.f32 %v792_v2, %v791_v23  ;;  %v806_v37 = vrot.slane %v805_v13, 4 }
 0x27c   :  { %v800_v5 = vadd.f32 %v799_v63, %v798_v24  ;;  %v812_v42 = vsel %vm391_vm0, %v724_v51, 0.0  ;;  %v819_v25 = vsel %vm391_vm0, %v725_v36, 0.0  ;;  %v826_v45 = vsel %vm391_vm0, %v726_v11, 0.0  ;;  %s1355_s5 = smov [#allocation8]  }
 0x27d   :  { %v780_v10 = vrot.slane %v779_v58, 2  ;;  %v788_v47 = vadd.f32 %v787_v41, %v786_v59  ;;  %v794_v50 = vrot.slane %v793_v1, 2  ;;  %v807_v46 = vadd.f32 %v806_v37, %v805_v13  ;;  %s902_s1 = sshll.u32 %s1355_s5, 4  ;;  %s903_s1 = int_to_ptr.vmem [resolvable:$true] %s902_s1 }
 0x27e   :  { %v801_v49 = vrot.slane %v800_v5, 2  ;;  %v813_v29 = vrot.slane %v812_v42, 4  ;;  %v820_v61 = vrot.slane %v819_v25, 4  ;;  %v827_v55 = vrot.slane %v826_v45, 4  ;;  %s1317_s17 = scalar_lea.vmem %s903_s1, 256  ;;  %p1322_p5 = scmp.lt.s32.totalorder %s903_s1, %s903_s1 }
 0x27f   :  { %v762_v48 = vadd.f32 %v761_v9, %v760_v53  ;;  %v795_v19 = vadd.f32 %v794_v50, %v793_v1  ;;  %v808_v60 = vrot.slane %v807_v46, 2  ;;  %v833_v39 = vsel %vm391_vm0, %v727_v31, 0.0  ;;  %p1318_p4 = scmp.ne.s32.totalorder %s903_s1, %s1317_s17  ;;  %p1323_p6 = scmp.lt.s32.totalorder %s1317_s17, %s1317_s17 }
 0x280   :  { %v802_v30 = vadd.f32 %v801_v49, %v800_v5  ;;  %v814_v18 = vadd.f32 %v813_v29, %v812_v42  ;;  %v821_v51 = vadd.f32 %v820_v61, %v819_v25  ;;  %v828_v62 = vadd.f32 %v827_v55, %v826_v45 }
 0x281   :  { %vm872_vm1 = vcmask 1041409   ;;  %v768_v36 = vrot.slane %v1772_v6, 1  ;;  %v781_v11 = vadd.f32 %v780_v10, %v779_v58  ;;  %v809_v38 = vadd.f32 %v808_v60, %v807_v46  ;;  %p1324_p7 = por %p1323_p6, %p1322_p5 }
 0x282   :  { %v834_v16 = vrot.slane %v833_v39, 4  ;;  %vm874_vm2 = vcmask 1042434   ;;  %v789_v26 = vrot.slane %v788_v47, 1  ;;  %v815_v44 = vrot.slane %v814_v18, 2 }
 0x283   :  { %v822_v54 = vrot.slane %v821_v51, 2  ;;  %v829_v57 = vrot.slane %v828_v62, 2  ;;  %vm876_vm3 = vcmask 1043459   ;;  %v796_v53 = vrot.slane %v795_v19, 1  ;;  %p1325_p8 = pnand %p1324_p7, %p1318_p4 }
 0x284   :  { %v803_v7 = vrot.slane %v802_v30, 1  ;;  %v835_v23 = vadd.f32 %v834_v16, %v833_v39  ;;  %v840_v31 = vmul.f32 %v1627_v32, %v1762_v3  ;;  %vm878_vm4 = vcmask 1044484  }
 0x285   :  { %v810_v9 = vrot.slane %v809_v38, 1  ;;  %v816_v59 = vadd.f32 %v815_v44, %v814_v18  ;;  %v823_v2 = vadd.f32 %v822_v54, %v821_v51  ;;  %v830_v24 = vadd.f32 %v829_v57, %v828_v62 }
 0x286   :  { %vm880_vm5 = vcmask 1045509   ;;  %v775_v58 = vrot.slane %v1774_v17, 1  ;;  %v836_v63 = vrot.slane %v835_v23, 2  ;;  %v841_v13 = vmul.f32 %v1635_v0, %v1766_v43 }
 0x287   :  { %v842_v41 = vmul.f32 %v1623_v27, %v1768_v28  ;;  %vm882_vm6 = vcmask 1046534   ;;  %v769_v1 = vadd.f32 %v768_v36, %v1772_v6  ;;  %v782_v37 = vrot.slane %v781_v11, 1 }
 0x288   :  { %v817_v32 = vrot.slane %v816_v59, 1  ;;  %v824_v3 = vrot.slane %v823_v2, 1  ;;  %vm884_vm7 = vcmask 1047559   ;;  %v790_v5 = vadd.f32 %v789_v26, %v788_v47 }
 0x289   :  { %v797_v42 = vadd.f32 %v796_v53, %v795_v19  ;;  %v804_v25 = vadd.f32 %v803_v7, %v802_v30  ;;  %v837_v45 = vadd.f32 %v836_v63, %v835_v23  ;;  %v811_v10 = vadd.f32 %v810_v9, %v809_v38 }
 0x28a   :  { %v818_v50 = vadd.f32 %v817_v32, %v816_v59  ;;  %v831_v46 = vrot.slane %v830_v24, 1  ;;  %v843_v49 = vmul.f32 %v1675_v20, %v755_v14  ;;  %v825_v0 = vadd.f32 %v824_v3, %v823_v2 }
 0x28b   :  { %v838_v43 = vrot.slane %v837_v45, 1  ;;  %v848_v27 = vmul.f32 %v1687_v35, %v790_v5  ;;  %v849_v28 = vmul.f32 %v1699_v56, %v797_v42  ;;  %v844_v6 = vmul.f32 %v1695_v40, %v762_v48 }
 0x28c   :  { %v845_v29 = vmul.f32 %v1705_v15, %v769_v1  ;;  %v850_v47 = vmul.f32 %v1669_v4, %v804_v25  ;;  %v852_v61 = vmul.f32 %v1747_v52, %v818_v50  ;;  %v851_v55 = vmul.f32 %v1713_v8, %v811_v10 }
 0x28d   :  { %v853_v19 = vmul.f32 %v1754_v21, %v825_v0  ;;  %v873_v20 = vsel %vm872_vm1, %v841_v13, %v840_v31  ;;  %v886_v14 = vsel %vm872_vm1, %v849_v28, %v848_v27  ;;  %v776_v35 = vadd.f32 %v775_v58, %v1774_v17 }
 0x28e   :  { %v832_v60 = vadd.f32 %v831_v46, %v830_v24  ;;  %v875_v56 = vsel %vm874_vm2, %v842_v41, %v873_v20  ;;  %v887_v40 = vsel %vm874_vm2, %v850_v47, %v886_v14  ;;  %v783_v15 = vadd.f32 %v782_v37, %v781_v11 }
 0x28f   :  { %v839_v48 = vadd.f32 %v838_v43, %v837_v45  ;;  %v877_v4 = vsel %vm876_vm3, %v843_v49, %v875_v56  ;;  %v888_v52 = vsel %vm876_vm3, %v851_v55, %v887_v40  ;;  %v846_v8 = vmul.f32 %v1709_v33, %v776_v35 }
 0x290   :  { %v854_v21 = vmul.f32 %v1735_v12, %v832_v60  ;;  %v879_v39 = vsel %vm878_vm4, %v844_v6, %v877_v4  ;;  %v889_v17 = vsel %vm878_vm4, %v852_v61, %v888_v52  ;;  %v847_v30 = vmul.f32 %v1718_v22, %v783_v15 }
 0x291   :  { %v855_v18 = vmul.f32 %v1739_v34, %v839_v48  ;;  %v881_v51 = vsel %vm880_vm5, %v845_v29, %v879_v39  ;;  %v890_v62 = vsel %vm880_vm5, %v853_v19, %v889_v17 }
 0x292   :  { %v883_v36 = vsel %vm882_vm6, %v846_v8, %v881_v51  ;;  %v891_v11 = vsel %vm882_vm6, %v854_v21, %v890_v62 }
 0x293   :  { %v885_v33 = vsel %vm884_vm7, %v847_v30, %v883_v36  ;;  %v892_v12 = vsel %vm884_vm7, %v855_v18, %v891_v11 }
 0x294   :  { %895 = vst [vmem:[#allocation8] sm:$0xff] %v885_v33  ;;  %896 = vst [vmem:[#allocation8 + $0x8] sm:$0xff] %v892_v12 }
 0x295   :  { %1328 = shalt.err (!%p1325_p8)
}
 0x296   :  { %s1329_s23 = scalar_lea.hbm %s1857_s4, 256 }
 0x297   :  { %p1330_p9 = scmp.ne.s32.totalorder %s1857_s4, %s1329_s23  ;;  %p1333_p10 = scmp.lt.u32.totalorder %s1329_s23, %s1857_s4 }
 0x299   :  { %p1335_p11 = pnand %p1333_p10, %p1330_p9 }
 0x29b   :  { %1338 = shalt.err (!%p1335_p11)
}
 0x29c   :  { %908 = dma.vmem_to_hbm [thread:$0]  %s903_s1, 256, %s1857_s4, [#allocation4], %s1348_s28, %s1348_s28, %s1349_s29  }
 0x29d   :  { %1343 = dma.done.wait [#allocation4], 256  }
 0x29e   :  { %1344 = vsyncadd [#allocation4], 4294967040 }
 0x29f   :  { %1345 = dma.done.wait [#allocation10], 1024  }
 0x2a0   :  { %1346 = vsyncadd [#allocation10], 4294966272 }
 0x2a1   :  { %927 = vsyncpa [#allocation3], 1 }
 0x2a2   :  { %928 = vsyncpa [#allocation6], 1 }
 0x2a3   :  { %929 = vsyncpa [#allocation4], 1 }
 0x2a4   :  { %930 = vsyncpa [#allocation10], 1 }

</bundles_post_ra>
